<compile_context>
chip_gen: v7x
topology: tpu7x:2x2x1
jax: 0.10.0
libtpu: 0.0.40
codegen_flags: <defaults>
</compile_context>

<pallas_src>
import functools

import jax
import jax.numpy as jnp
from jax import lax
from jax.experimental import pallas as pl
from jax.experimental.pallas import tpu as pltpu

_MAX_LANE_TILE = 8192  # lanes per spatial tile; blocks stay ~1 MiB even double-buffered


def _pick_lane_tile(hw):
    """Spatial (lane) tile: full H*W when small, else a 128-multiple divisor."""
    if hw <= _MAX_LANE_TILE:
        return hw
    for t in (8192, 4096, 2048, 1024, 512, 256, 128):
        if hw % t == 0:
            return t
    return hw  # TODO(synk): odd H*W larger than the cap falls back to one full-row block.


# ---------------------------------------------------------------------------
# In-kernel math helpers
# ---------------------------------------------------------------------------

def _channel_log_softmax(x):
    """log_softmax over axis 0 (channels live on sublanes)."""
    m = jnp.max(x, axis=0, keepdims=True)
    s = x - m
    return s - jnp.log(jnp.sum(jnp.exp(s), axis=0, keepdims=True))


def _group_reduce(x, c, op):
    """All-reduce with `op` inside aligned groups of `c` consecutive lanes.

    Butterfly over lane-shifted copies.  The shifted copies are built with
    jnp.roll (static lane slice + concat); wrapped-around lanes are never
    selected by the parity masks, so the result is exact.  `c` must be a
    power of two that divides the lane tile.
    """
    lane = lax.broadcasted_iota(jnp.int32, x.shape, x.ndim - 1)
    d = 1
    while d < c:
        fwd = jnp.roll(x, -d, axis=-1)   # lane i -> x[..., i + d]
        bwd = jnp.roll(x, d, axis=-1)    # lane i -> x[..., i - d]
        x = op(x, jnp.where(lane % (2 * d) < d, fwd, bwd))
        d *= 2
    return x


def _group_log_softmax(x, c):
    """log_softmax over aligned groups of `c` consecutive lanes (torch .view(-1, C))."""
    m = _group_reduce(x, c, jnp.maximum)
    s = x - m
    z = _group_reduce(jnp.exp(s), c, jnp.add)
    return s - jnp.log(z)


def _focal_weight(pt, gamma):
    """(1 - pt) ** gamma, keeping integer gamma off the EUP (plain VPU multiplies)."""
    base = 1.0 - pt
    if float(gamma) == int(gamma):
        g = int(gamma)
        if g == 2:
            return base * base
        return lax.integer_pow(base, g)
    return base ** gamma


# ---------------------------------------------------------------------------
# Fused kernels (one per tensor pair)
# ---------------------------------------------------------------------------

def _mask_pair_kernel(mt_ref, md_ref, lbl_ref, o_ref, *, c, alpha_t2, inv_t):
    """CE(texture) + CE(deformation) + alpha*t^2 * KL(deformation || texture)."""
    @pl.when(pl.program_id(1) == 0)
    def _():
        o_ref[...] = jnp.zeros_like(o_ref)

    xt = mt_ref[0].astype(jnp.float32)            # (C, T) texture logits
    xd = md_ref[0].astype(jnp.float32)            # (C, T) deformation logits
    lbl = lbl_ref[0]                              # (1, T) int32 per-pixel class

    # Cross-entropy: softmax over the true channel (sublane) axis.
    logp_t = _channel_log_softmax(xt)
    logp_d = _channel_log_softmax(xd)
    chan = lax.broadcasted_iota(jnp.int32, xt.shape, 0)
    ce = -jnp.where(chan == lbl, logp_t + logp_d, 0.0)

    # KL consistency, bug-for-bug torch `.view(-1, C)` on contiguous NCHW:
    # softmax over aligned groups of C consecutive lanes (W pixels).
    zt = xt if inv_t == 1.0 else xt * inv_t
    zd = xd if inv_t == 1.0 else xd * inv_t
    logp = _group_log_softmax(zt, c)              # target distribution (texture)
    logq = _group_log_softmax(zd, c)              # input log-probs (deformation)
    kl = jnp.exp(logp) * (logp - logq)

    o_ref[0] = o_ref[0] + (ce + alpha_t2 * kl)


def _boundary_pair_kernel(bt_ref, bd_ref, tgt_ref, o_ref, *, c, gamma, alpha_t2, inv_t):
    """Focal(texture) + Focal(deformation) + alpha*t^2 * KL(deformation || texture)."""
    @pl.when(pl.program_id(1) == 0)
    def _():
        o_ref[...] = jnp.zeros_like(o_ref)

    xt = bt_ref[0].astype(jnp.float32)            # (C, T)
    xd = bd_ref[0].astype(jnp.float32)            # (C, T)
    tgt = tgt_ref[0]                              # (C, T) int32: group target per lane

    member = lax.broadcasted_iota(jnp.int32, xt.shape, 1) % c
    pick = member == tgt

    logp_t = _group_log_softmax(xt, c)
    logp_d = _group_log_softmax(xd, c)

    def focal(logp):
        pt = jnp.exp(logp)
        return jnp.where(pick, -_focal_weight(pt, gamma) * logp, 0.0)

    contrib = focal(logp_t) + focal(logp_d)

    if inv_t == 1.0:                              # t == 1: reuse the focal log-softmaxes
        logp, logq = logp_t, logp_d
    else:
        logp = _group_log_softmax(xt * inv_t, c)
        logq = _group_log_softmax(xd * inv_t, c)
    kl = jnp.exp(logp) * (logp - logq)

    o_ref[0] = o_ref[0] + (contrib + alpha_t2 * kl)


# ---------------------------------------------------------------------------
# Launcher + loss wrapper
# ---------------------------------------------------------------------------

def _fused_pair_call(kernel, x_t, x_d, aux):
    """Run one fused pair-loss kernel; returns the un-normalised scalar sum."""
    n, c, hw = x_t.shape
    a = aux.shape[1]
    t = _pick_lane_tile(hw)
    out = pl.pallas_call(
        kernel,
        out_shape=jax.ShapeDtypeStruct((n, c, t), jnp.float32),
        grid=(n, hw // t),
        in_specs=[
            pl.BlockSpec((1, c, t), lambda i, s: (i, 0, s)),
            pl.BlockSpec((1, c, t), lambda i, s: (i, 0, s)),
            pl.BlockSpec((1, a, t), lambda i, s: (i, 0, s)),
        ],
        out_specs=pl.BlockSpec((1, c, t), lambda i, s: (i, 0, 0)),
        compiler_params=pltpu.CompilerParams(
            dimension_semantics=("parallel", "arbitrary")),
    )(x_t, x_d, aux)
    return jnp.sum(out)


def total_loss(mask_deformation, mask, boundary_deformation, boundary,
               mask_texture, boundary_texture, *,
               gamma=2, t=1.0, alpha=1.0, Lambda=1.0):
    N, C, H, W = mask_texture.shape
    HW = H * W
    if HW % C != 0 or (C & (C - 1)) != 0 or 128 % C != 0:
        # TODO(synk): general C / H*W would need a different group decomposition.
        raise NotImplementedError(
            "fused kernels require C a power of two dividing 128 and H*W % C == 0")

    t = float(t)
    inv_t = 1.0 / t
    alpha_t2 = float(alpha) * t * t

    # Free row-major reshapes of the NCHW buffers (no data movement).
    mt = mask_texture.reshape(N, C, HW)
    md = mask_deformation.reshape(N, C, HW)
    labels = mask.astype(jnp.int32).reshape(N, 1, HW)        # mask.long().squeeze(1)

    bt = boundary_texture.reshape(N, C, HW)
    bd = boundary_deformation.reshape(N, C, HW)
    # Per-lane group target matching torch's flat `.view(-1, 1)` grouping.
    # (small XLA expansion; keeps the kernel itself fully elementwise here)
    btgt = jnp.repeat(boundary.astype(jnp.int32).reshape(N, C, HW // C), C, axis=-1)

    mask_sum = _fused_pair_call(
        functools.partial(_mask_pair_kernel, c=C, alpha_t2=alpha_t2, inv_t=inv_t),
        mt, md, labels)
    boundary_sum = _fused_pair_call(
        functools.partial(_boundary_pair_kernel, c=C, gamma=gamma,
                          alpha_t2=alpha_t2, inv_t=inv_t),
        bt, bd, btgt)

    denom = float(N * HW)   # CE mean, focal mean and KL 'batchmean' all divide by N*H*W
    return mask_sum / denom + Lambda * (boundary_sum / denom)


# ---------------------------------------------------------------------------
# Pure-JAX reference (replicates the PyTorch semantics) for verification
# ---------------------------------------------------------------------------

def _ref_total_loss(md, mask, bd, boundary, mt, bt, *, gamma, t, alpha, Lambda):
    def ce(logits, lbl):
        N, C, H, W = logits.shape
        x = jnp.transpose(logits, (0, 2, 3, 1)).reshape(-1, C)
        l = lbl.reshape(-1)
        logp = jax.nn.log_softmax(x, axis=-1)
        return -jnp.mean(jnp.take_along_axis(logp, l[:, None], axis=1))

    def focal(logits, tgt):
        C = logits.shape[1]
        x = logits.reshape(-1, C)
        ti = tgt.reshape(-1, tgt.shape[1]).astype(jnp.int32)
        logp = jax.nn.log_softmax(x, axis=-1)
        logpt = jnp.take_along_axis(logp, ti, axis=1).reshape(-1)
        pt = jnp.exp(logpt)
        return jnp.mean(-((1.0 - pt) ** gamma) * logpt)

    def kl(a, b):
        C = a.shape[1]
        xa = jax.nn.log_softmax(a.reshape(-1, C) / t, axis=1)
        pb = jax.nn.softmax(b.reshape(-1, C) / t, axis=1)
        return jnp.sum(pb * (jnp.log(pb) - xa)) / xa.shape[0] * t * t

    mlbl = mask.astype(jnp.int32)[:, 0]
    lm = ce(mt, mlbl) + ce(md, mlbl) + alpha * kl(md, mt)
    lb = Lambda * (focal(bt, boundary) + focal(bd, boundary) + alpha * kl(bd, bt))
    return lm + lb


if __name__ == "__main__":
    key = jax.random.PRNGKey(0)
    N, C, H, W = 2, 4, 16, 16
    ks = jax.random.split(key, 6)
    mask_deformation = jax.random.normal(ks[0], (N, C, H, W), jnp.float32)
    mask_texture = jax.random.normal(ks[1], (N, C, H, W), jnp.float32)
    boundary_deformation = jax.random.normal(ks[2], (N, C, H, W), jnp.float32)
    boundary_texture = jax.random.normal(ks[3], (N, C, H, W), jnp.float32)
    mask = jax.random.randint(ks[4], (N, 1, H, W), 0, C, jnp.int32)
    boundary = jax.random.randint(ks[5], (N, 1, H, W), 0, C, jnp.int32)

    hyper = dict(gamma=2, t=1.0, alpha=0.5, Lambda=1.0)

    loss = total_loss(mask_deformation, mask, boundary_deformation, boundary,
                      mask_texture, boundary_texture, **hyper)
    loss = jax.block_until_ready(loss)

    ref = _ref_total_loss(mask_deformation, mask, boundary_deformation, boundary,
                          mask_texture, boundary_texture, **hyper)
    assert bool(jnp.isfinite(loss)), "loss is not finite"
    assert abs(float(loss) - float(ref)) < 1e-3 * max(1.0, abs(float(ref))), \
        f"mismatch: pallas={float(loss)} ref={float(ref)}"
    assert float(loss) >= 0.0, "Total loss is negative."
    print("KERNEL_OK")
</pallas_src>

<mosaic_0001>
module attributes {stable_mosaic.version = 11 : i64} {
  func.func @_mask_pair_kernel(%arg0: i32, %arg1: i32, %arg2: memref<1x4x256xf32, #tpu.memory_space<vmem>>, %arg3: memref<1x4x256xf32, #tpu.memory_space<vmem>>, %arg4: memref<1x1x256xi32, #tpu.memory_space<vmem>>, %arg5: memref<1x4x256xf32, #tpu.memory_space<vmem>>) attributes {dimension_semantics = [#tpu.dimension_semantics<parallel>, #tpu.dimension_semantics<arbitrary>], iteration_bounds = array<i64: 2, 1>, scalar_prefetch = 0 : i64, scratch_operands = 0 : i64, tpu.core_type = #tpu.core_type<tc>, window_params = [{transform_indices = @transform_0, window_bounds = array<i64: 1, 4, 256>}, {transform_indices = @transform_1, window_bounds = array<i64: 1, 4, 256>}, {transform_indices = @transform_2, window_bounds = array<i64: 1, 1, 256>}, {transform_indices = @transform_3, window_bounds = array<i64: 1, 4, 256>}]} {
    %c0_i32 = arith.constant 0 : i32
    %0 = arith.cmpi eq, %arg1, %c0_i32 : i32
    %1 = arith.extui %0 : i1 to i32
    %c0_i32_0 = arith.constant 0 : i32
    %2 = arith.cmpi ne, %1, %c0_i32_0 : i32
    scf.if %2 {
      %cst_74 = arith.constant 0.000000e+00 : f32
      %269 = vector.broadcast %cst_74 : f32 to vector<1x4x256xf32>
      %c0_75 = arith.constant 0 : index
      %c0_76 = arith.constant 0 : index
      %c0_77 = arith.constant 0 : index
      %270 = vector.load %arg5[%c0_75, %c0_76, %c0_77] : memref<1x4x256xf32, #tpu.memory_space<vmem>>, vector<1x4x256xf32>
      tpu.vector_store %arg5[%c0_75, %c0_76, %c0_77], %269 {strides = array<i32>} : memref<1x4x256xf32, #tpu.memory_space<vmem>>, vector<1x4x256xf32>,
    } else {
    }
    %c0 = arith.constant 0 : index
    %c0_1 = arith.constant 0 : index
    %c0_2 = arith.constant 0 : index
    %3 = vector.load %arg2[%c0, %c0_1, %c0_2] : memref<1x4x256xf32, #tpu.memory_space<vmem>>, vector<1x4x256xf32>
    %4 = vector.shape_cast %3 : vector<1x4x256xf32> to vector<4x256xf32>
    %c0_3 = arith.constant 0 : index
    %c0_4 = arith.constant 0 : index
    %c0_5 = arith.constant 0 : index
    %5 = vector.load %arg3[%c0_3, %c0_4, %c0_5] : memref<1x4x256xf32, #tpu.memory_space<vmem>>, vector<1x4x256xf32>
    %6 = vector.shape_cast %5 : vector<1x4x256xf32> to vector<4x256xf32>
    %c0_6 = arith.constant 0 : index
    %c0_7 = arith.constant 0 : index
    %c0_8 = arith.constant 0 : index
    %7 = vector.load %arg4[%c0_6, %c0_7, %c0_8] : memref<1x1x256xi32, #tpu.memory_space<vmem>>, vector<1x1x256xi32>
    %8 = vector.shape_cast %7 : vector<1x1x256xi32> to vector<1x256xi32>
    %cst = arith.constant dense<0xFF800000> : vector<256xf32>
    %9 = vector.multi_reduction <maximumf>, %4, %cst [0] : vector<4x256xf32> to vector<256xf32>
    %10 = vector.shape_cast %9 : vector<256xf32> to vector<1x256xf32>
    %11 = vector.broadcast %10 : vector<1x256xf32> to vector<4x256xf32>
    %12 = arith.subf %4, %11 : vector<4x256xf32>
    %13 = math.exp %12 : vector<4x256xf32>
    %cst_9 = arith.constant dense<0.000000e+00> : vector<256xf32>
    %14 = vector.multi_reduction <add>, %13, %cst_9 [0] : vector<4x256xf32> to vector<256xf32>
    %15 = vector.shape_cast %14 : vector<256xf32> to vector<1x256xf32>
    %16 = math.log %15 : vector<1x256xf32>
    %17 = vector.broadcast %16 : vector<1x256xf32> to vector<4x256xf32>
    %18 = arith.subf %12, %17 : vector<4x256xf32>
    %cst_10 = arith.constant dense<0xFF800000> : vector<256xf32>
    %19 = vector.multi_reduction <maximumf>, %6, %cst_10 [0] : vector<4x256xf32> to vector<256xf32>
    %20 = vector.shape_cast %19 : vector<256xf32> to vector<1x256xf32>
    %21 = vector.broadcast %20 : vector<1x256xf32> to vector<4x256xf32>
    %22 = arith.subf %6, %21 : vector<4x256xf32>
    %23 = math.exp %22 : vector<4x256xf32>
    %cst_11 = arith.constant dense<0.000000e+00> : vector<256xf32>
    %24 = vector.multi_reduction <add>, %23, %cst_11 [0] : vector<4x256xf32> to vector<256xf32>
    %25 = vector.shape_cast %24 : vector<256xf32> to vector<1x256xf32>
    %26 = math.log %25 : vector<1x256xf32>
    %27 = vector.broadcast %26 : vector<1x256xf32> to vector<4x256xf32>
    %28 = arith.subf %22, %27 : vector<4x256xf32>
    %29 = tpu.iota {dimensions = array<i32: 0>} : vector<4x256xi32>
    %30 = vector.broadcast %8 : vector<1x256xi32> to vector<4x256xi32>
    %31 = arith.cmpi eq, %29, %30 : vector<4x256xi32>
    %32 = arith.addf %18, %28 : vector<4x256xf32>
    %cst_12 = arith.constant 0.000000e+00 : f32
    %33 = vector.broadcast %cst_12 : f32 to vector<4x256xf32>
    %34 = arith.select %31, %32, %33 : vector<4x256xi1>, vector<4x256xf32>
    %cst_13 = arith.constant 0.000000e+00 : f32
    %35 = vector.broadcast %cst_13 : f32 to vector<4x256xf32>
    %36 = arith.subf %35, %34 : vector<4x256xf32>
    %37 = tpu.iota {dimensions = array<i32: 1>} : vector<4x256xi32>
    %38 = vector.extract_strided_slice %4 {offsets = [0, 1], sizes = [4, 255], strides = [1, 1]} : vector<4x256xf32> to vector<4x255xf32>
    %39 = vector.extract_strided_slice %4 {offsets = [0, 0], sizes = [4, 1], strides = [1, 1]} : vector<4x256xf32> to vector<4x1xf32>
    %40 = tpu.concatenate %38, %39 in 1 : vector<4x255xf32>, vector<4x1xf32> -> vector<4x256xf32>
    %41 = vector.extract_strided_slice %4 {offsets = [0, 255], sizes = [4, 1], strides = [1, 1]} : vector<4x256xf32> to vector<4x1xf32>
    %42 = vector.extract_strided_slice %4 {offsets = [0, 0], sizes = [4, 255], strides = [1, 1]} : vector<4x256xf32> to vector<4x255xf32>
    %43 = tpu.concatenate %41, %42 in 1 : vector<4x1xf32>, vector<4x255xf32> -> vector<4x256xf32>
    %c2_i32 = arith.constant 2 : i32
    %c0_i32_14 = arith.constant 0 : i32
    %44 = arith.cmpi eq, %c2_i32, %c0_i32_14 : i32
    %c1_i32 = arith.constant 1 : i32
    %45 = arith.select %44, %c1_i32, %c2_i32 : i32
    %46 = vector.broadcast %45 : i32 to vector<4x256xi32>
    %47 = arith.remsi %37, %46 : vector<4x256xi32>
    %c0_i32_15 = arith.constant 0 : i32
    %48 = vector.broadcast %c0_i32_15 : i32 to vector<4x256xi32>
    %49 = arith.cmpi ne, %47, %48 : vector<4x256xi32>
    %c0_i32_16 = arith.constant 0 : i32
    %50 = vector.broadcast %c0_i32_16 : i32 to vector<4x256xi32>
    %51 = arith.cmpi slt, %47, %50 : vector<4x256xi32>
    %c0_i32_17 = arith.constant 0 : i32
    %52 = arith.cmpi slt, %45, %c0_i32_17 : i32
    %53 = vector.broadcast %52 : i1 to vector<4x256xi1>
    %54 = vector.broadcast %53 : vector<4x256xi1> to vector<4x256xi1>
    %55 = arith.xori %51, %54 : vector<4x256xi1>
    %56 = arith.andi %55, %49 : vector<4x256xi1>
    %57 = vector.broadcast %45 : i32 to vector<4x256xi32>
    %58 = arith.addi %47, %57 : vector<4x256xi32>
    %59 = arith.select %56, %58, %47 : vector<4x256xi1>, vector<4x256xi32>
    %c1_i32_18 = arith.constant 1 : i32
    %60 = vector.broadcast %c1_i32_18 : i32 to vector<4x256xi32>
    %61 = arith.cmpi slt, %59, %60 : vector<4x256xi32>
    %62 = arith.select %61, %40, %43 : vector<4x256xi1>, vector<4x256xf32>
    %63 = arith.maximumf %4, %62 : vector<4x256xf32>
    %64 = vector.extract_strided_slice %63 {offsets = [0, 2], sizes = [4, 254], strides = [1, 1]} : vector<4x256xf32> to vector<4x254xf32>
    %65 = vector.extract_strided_slice %63 {offsets = [0, 0], sizes = [4, 2], strides = [1, 1]} : vector<4x256xf32> to vector<4x2xf32>
    %66 = tpu.concatenate %64, %65 in 1 : vector<4x254xf32>, vector<4x2xf32> -> vector<4x256xf32>
    %67 = vector.extract_strided_slice %63 {offsets = [0, 254], sizes = [4, 2], strides = [1, 1]} : vector<4x256xf32> to vector<4x2xf32>
    %68 = vector.extract_strided_slice %63 {offsets = [0, 0], sizes = [4, 254], strides = [1, 1]} : vector<4x256xf32> to vector<4x254xf32>
    %69 = tpu.concatenate %67, %68 in 1 : vector<4x2xf32>, vector<4x254xf32> -> vector<4x256xf32>
    %c4_i32 = arith.constant 4 : i32
    %c0_i32_19 = arith.constant 0 : i32
    %70 = arith.cmpi eq, %c4_i32, %c0_i32_19 : i32
    %c1_i32_20 = arith.constant 1 : i32
    %71 = arith.select %70, %c1_i32_20, %c4_i32 : i32
    %72 = vector.broadcast %71 : i32 to vector<4x256xi32>
    %73 = arith.remsi %37, %72 : vector<4x256xi32>
    %c0_i32_21 = arith.constant 0 : i32
    %74 = vector.broadcast %c0_i32_21 : i32 to vector<4x256xi32>
    %75 = arith.cmpi ne, %73, %74 : vector<4x256xi32>
    %c0_i32_22 = arith.constant 0 : i32
    %76 = vector.broadcast %c0_i32_22 : i32 to vector<4x256xi32>
    %77 = arith.cmpi slt, %73, %76 : vector<4x256xi32>
    %c0_i32_23 = arith.constant 0 : i32
    %78 = arith.cmpi slt, %71, %c0_i32_23 : i32
    %79 = vector.broadcast %78 : i1 to vector<4x256xi1>
    %80 = vector.broadcast %79 : vector<4x256xi1> to vector<4x256xi1>
    %81 = arith.xori %77, %80 : vector<4x256xi1>
    %82 = arith.andi %81, %75 : vector<4x256xi1>
    %83 = vector.broadcast %71 : i32 to vector<4x256xi32>
    %84 = arith.addi %73, %83 : vector<4x256xi32>
    %85 = arith.select %82, %84, %73 : vector<4x256xi1>, vector<4x256xi32>
    %c2_i32_24 = arith.constant 2 : i32
    %86 = vector.broadcast %c2_i32_24 : i32 to vector<4x256xi32>
    %87 = arith.cmpi slt, %85, %86 : vector<4x256xi32>
    %88 = arith.select %87, %66, %69 : vector<4x256xi1>, vector<4x256xf32>
    %89 = arith.maximumf %63, %88 : vector<4x256xf32>
    %90 = arith.subf %4, %89 : vector<4x256xf32>
    %91 = math.exp %90 : vector<4x256xf32>
    %92 = tpu.iota {dimensions = array<i32: 1>} : vector<4x256xi32>
    %93 = vector.extract_strided_slice %91 {offsets = [0, 1], sizes = [4, 255], strides = [1, 1]} : vector<4x256xf32> to vector<4x255xf32>
    %94 = vector.extract_strided_slice %91 {offsets = [0, 0], sizes = [4, 1], strides = [1, 1]} : vector<4x256xf32> to vector<4x1xf32>
    %95 = tpu.concatenate %93, %94 in 1 : vector<4x255xf32>, vector<4x1xf32> -> vector<4x256xf32>
    %96 = vector.extract_strided_slice %91 {offsets = [0, 255], sizes = [4, 1], strides = [1, 1]} : vector<4x256xf32> to vector<4x1xf32>
    %97 = vector.extract_strided_slice %91 {offsets = [0, 0], sizes = [4, 255], strides = [1, 1]} : vector<4x256xf32> to vector<4x255xf32>
    %98 = tpu.concatenate %96, %97 in 1 : vector<4x1xf32>, vector<4x255xf32> -> vector<4x256xf32>
    %c2_i32_25 = arith.constant 2 : i32
    %c0_i32_26 = arith.constant 0 : i32
    %99 = arith.cmpi eq, %c2_i32_25, %c0_i32_26 : i32
    %c1_i32_27 = arith.constant 1 : i32
    %100 = arith.select %99, %c1_i32_27, %c2_i32_25 : i32
    %101 = vector.broadcast %100 : i32 to vector<4x256xi32>
    %102 = arith.remsi %92, %101 : vector<4x256xi32>
    %c0_i32_28 = arith.constant 0 : i32
    %103 = vector.broadcast %c0_i32_28 : i32 to vector<4x256xi32>
    %104 = arith.cmpi ne, %102, %103 : vector<4x256xi32>
    %c0_i32_29 = arith.constant 0 : i32
    %105 = vector.broadcast %c0_i32_29 : i32 to vector<4x256xi32>
    %106 = arith.cmpi slt, %102, %105 : vector<4x256xi32>
    %c0_i32_30 = arith.constant 0 : i32
    %107 = arith.cmpi slt, %100, %c0_i32_30 : i32
    %108 = vector.broadcast %107 : i1 to vector<4x256xi1>
    %109 = vector.broadcast %108 : vector<4x256xi1> to vector<4x256xi1>
    %110 = arith.xori %106, %109 : vector<4x256xi1>
    %111 = arith.andi %110, %104 : vector<4x256xi1>
    %112 = vector.broadcast %100 : i32 to vector<4x256xi32>
    %113 = arith.addi %102, %112 : vector<4x256xi32>
    %114 = arith.select %111, %113, %102 : vector<4x256xi1>, vector<4x256xi32>
    %c1_i32_31 = arith.constant 1 : i32
    %115 = vector.broadcast %c1_i32_31 : i32 to vector<4x256xi32>
    %116 = arith.cmpi slt, %114, %115 : vector<4x256xi32>
    %117 = arith.select %116, %95, %98 : vector<4x256xi1>, vector<4x256xf32>
    %118 = arith.addf %91, %117 : vector<4x256xf32>
    %119 = vector.extract_strided_slice %118 {offsets = [0, 2], sizes = [4, 254], strides = [1, 1]} : vector<4x256xf32> to vector<4x254xf32>
    %120 = vector.extract_strided_slice %118 {offsets = [0, 0], sizes = [4, 2], strides = [1, 1]} : vector<4x256xf32> to vector<4x2xf32>
    %121 = tpu.concatenate %119, %120 in 1 : vector<4x254xf32>, vector<4x2xf32> -> vector<4x256xf32>
    %122 = vector.extract_strided_slice %118 {offsets = [0, 254], sizes = [4, 2], strides = [1, 1]} : vector<4x256xf32> to vector<4x2xf32>
    %123 = vector.extract_strided_slice %118 {offsets = [0, 0], sizes = [4, 254], strides = [1, 1]} : vector<4x256xf32> to vector<4x254xf32>
    %124 = tpu.concatenate %122, %123 in 1 : vector<4x2xf32>, vector<4x254xf32> -> vector<4x256xf32>
    %c4_i32_32 = arith.constant 4 : i32
    %c0_i32_33 = arith.constant 0 : i32
    %125 = arith.cmpi eq, %c4_i32_32, %c0_i32_33 : i32
    %c1_i32_34 = arith.constant 1 : i32
    %126 = arith.select %125, %c1_i32_34, %c4_i32_32 : i32
    %127 = vector.broadcast %126 : i32 to vector<4x256xi32>
    %128 = arith.remsi %92, %127 : vector<4x256xi32>
    %c0_i32_35 = arith.constant 0 : i32
    %129 = vector.broadcast %c0_i32_35 : i32 to vector<4x256xi32>
    %130 = arith.cmpi ne, %128, %129 : vector<4x256xi32>
    %c0_i32_36 = arith.constant 0 : i32
    %131 = vector.broadcast %c0_i32_36 : i32 to vector<4x256xi32>
    %132 = arith.cmpi slt, %128, %131 : vector<4x256xi32>
    %c0_i32_37 = arith.constant 0 : i32
    %133 = arith.cmpi slt, %126, %c0_i32_37 : i32
    %134 = vector.broadcast %133 : i1 to vector<4x256xi1>
    %135 = vector.broadcast %134 : vector<4x256xi1> to vector<4x256xi1>
    %136 = arith.xori %132, %135 : vector<4x256xi1>
    %137 = arith.andi %136, %130 : vector<4x256xi1>
    %138 = vector.broadcast %126 : i32 to vector<4x256xi32>
    %139 = arith.addi %128, %138 : vector<4x256xi32>
    %140 = arith.select %137, %139, %128 : vector<4x256xi1>, vector<4x256xi32>
    %c2_i32_38 = arith.constant 2 : i32
    %141 = vector.broadcast %c2_i32_38 : i32 to vector<4x256xi32>
    %142 = arith.cmpi slt, %140, %141 : vector<4x256xi32>
    %143 = arith.select %142, %121, %124 : vector<4x256xi1>, vector<4x256xf32>
    %144 = arith.addf %118, %143 : vector<4x256xf32>
    %145 = math.log %144 : vector<4x256xf32>
    %146 = arith.subf %90, %145 : vector<4x256xf32>
    %147 = tpu.iota {dimensions = array<i32: 1>} : vector<4x256xi32>
    %148 = vector.extract_strided_slice %6 {offsets = [0, 1], sizes = [4, 255], strides = [1, 1]} : vector<4x256xf32> to vector<4x255xf32>
    %149 = vector.extract_strided_slice %6 {offsets = [0, 0], sizes = [4, 1], strides = [1, 1]} : vector<4x256xf32> to vector<4x1xf32>
    %150 = tpu.concatenate %148, %149 in 1 : vector<4x255xf32>, vector<4x1xf32> -> vector<4x256xf32>
    %151 = vector.extract_strided_slice %6 {offsets = [0, 255], sizes = [4, 1], strides = [1, 1]} : vector<4x256xf32> to vector<4x1xf32>
    %152 = vector.extract_strided_slice %6 {offsets = [0, 0], sizes = [4, 255], strides = [1, 1]} : vector<4x256xf32> to vector<4x255xf32>
    %153 = tpu.concatenate %151, %152 in 1 : vector<4x1xf32>, vector<4x255xf32> -> vector<4x256xf32>
    %c2_i32_39 = arith.constant 2 : i32
    %c0_i32_40 = arith.constant 0 : i32
    %154 = arith.cmpi eq, %c2_i32_39, %c0_i32_40 : i32
    %c1_i32_41 = arith.constant 1 : i32
    %155 = arith.select %154, %c1_i32_41, %c2_i32_39 : i32
    %156 = vector.broadcast %155 : i32 to vector<4x256xi32>
    %157 = arith.remsi %147, %156 : vector<4x256xi32>
    %c0_i32_42 = arith.constant 0 : i32
    %158 = vector.broadcast %c0_i32_42 : i32 to vector<4x256xi32>
    %159 = arith.cmpi ne, %157, %158 : vector<4x256xi32>
    %c0_i32_43 = arith.constant 0 : i32
    %160 = vector.broadcast %c0_i32_43 : i32 to vector<4x256xi32>
    %161 = arith.cmpi slt, %157, %160 : vector<4x256xi32>
    %c0_i32_44 = arith.constant 0 : i32
    %162 = arith.cmpi slt, %155, %c0_i32_44 : i32
    %163 = vector.broadcast %162 : i1 to vector<4x256xi1>
    %164 = vector.broadcast %163 : vector<4x256xi1> to vector<4x256xi1>
    %165 = arith.xori %161, %164 : vector<4x256xi1>
    %166 = arith.andi %165, %159 : vector<4x256xi1>
    %167 = vector.broadcast %155 : i32 to vector<4x256xi32>
    %168 = arith.addi %157, %167 : vector<4x256xi32>
    %169 = arith.select %166, %168, %157 : vector<4x256xi1>, vector<4x256xi32>
    %c1_i32_45 = arith.constant 1 : i32
    %170 = vector.broadcast %c1_i32_45 : i32 to vector<4x256xi32>
    %171 = arith.cmpi slt, %169, %170 : vector<4x256xi32>
    %172 = arith.select %171, %150, %153 : vector<4x256xi1>, vector<4x256xf32>
    %173 = arith.maximumf %6, %172 : vector<4x256xf32>
    %174 = vector.extract_strided_slice %173 {offsets = [0, 2], sizes = [4, 254], strides = [1, 1]} : vector<4x256xf32> to vector<4x254xf32>
    %175 = vector.extract_strided_slice %173 {offsets = [0, 0], sizes = [4, 2], strides = [1, 1]} : vector<4x256xf32> to vector<4x2xf32>
    %176 = tpu.concatenate %174, %175 in 1 : vector<4x254xf32>, vector<4x2xf32> -> vector<4x256xf32>
    %177 = vector.extract_strided_slice %173 {offsets = [0, 254], sizes = [4, 2], strides = [1, 1]} : vector<4x256xf32> to vector<4x2xf32>
    %178 = vector.extract_strided_slice %173 {offsets = [0, 0], sizes = [4, 254], strides = [1, 1]} : vector<4x256xf32> to vector<4x254xf32>
    %179 = tpu.concatenate %177, %178 in 1 : vector<4x2xf32>, vector<4x254xf32> -> vector<4x256xf32>
    %c4_i32_46 = arith.constant 4 : i32
    %c0_i32_47 = arith.constant 0 : i32
    %180 = arith.cmpi eq, %c4_i32_46, %c0_i32_47 : i32
    %c1_i32_48 = arith.constant 1 : i32
    %181 = arith.select %180, %c1_i32_48, %c4_i32_46 : i32
    %182 = vector.broadcast %181 : i32 to vector<4x256xi32>
    %183 = arith.remsi %147, %182 : vector<4x256xi32>
    %c0_i32_49 = arith.constant 0 : i32
    %184 = vector.broadcast %c0_i32_49 : i32 to vector<4x256xi32>
    %185 = arith.cmpi ne, %183, %184 : vector<4x256xi32>
    %c0_i32_50 = arith.constant 0 : i32
    %186 = vector.broadcast %c0_i32_50 : i32 to vector<4x256xi32>
    %187 = arith.cmpi slt, %183, %186 : vector<4x256xi32>
    %c0_i32_51 = arith.constant 0 : i32
    %188 = arith.cmpi slt, %181, %c0_i32_51 : i32
    %189 = vector.broadcast %188 : i1 to vector<4x256xi1>
    %190 = vector.broadcast %189 : vector<4x256xi1> to vector<4x256xi1>
    %191 = arith.xori %187, %190 : vector<4x256xi1>
    %192 = arith.andi %191, %185 : vector<4x256xi1>
    %193 = vector.broadcast %181 : i32 to vector<4x256xi32>
    %194 = arith.addi %183, %193 : vector<4x256xi32>
    %195 = arith.select %192, %194, %183 : vector<4x256xi1>, vector<4x256xi32>
    %c2_i32_52 = arith.constant 2 : i32
    %196 = vector.broadcast %c2_i32_52 : i32 to vector<4x256xi32>
    %197 = arith.cmpi slt, %195, %196 : vector<4x256xi32>
    %198 = arith.select %197, %176, %179 : vector<4x256xi1>, vector<4x256xf32>
    %199 = arith.maximumf %173, %198 : vector<4x256xf32>
    %200 = arith.subf %6, %199 : vector<4x256xf32>
    %201 = math.exp %200 : vector<4x256xf32>
    %202 = tpu.iota {dimensions = array<i32: 1>} : vector<4x256xi32>
    %203 = vector.extract_strided_slice %201 {offsets = [0, 1], sizes = [4, 255], strides = [1, 1]} : vector<4x256xf32> to vector<4x255xf32>
    %204 = vector.extract_strided_slice %201 {offsets = [0, 0], sizes = [4, 1], strides = [1, 1]} : vector<4x256xf32> to vector<4x1xf32>
    %205 = tpu.concatenate %203, %204 in 1 : vector<4x255xf32>, vector<4x1xf32> -> vector<4x256xf32>
    %206 = vector.extract_strided_slice %201 {offsets = [0, 255], sizes = [4, 1], strides = [1, 1]} : vector<4x256xf32> to vector<4x1xf32>
    %207 = vector.extract_strided_slice %201 {offsets = [0, 0], sizes = [4, 255], strides = [1, 1]} : vector<4x256xf32> to vector<4x255xf32>
    %208 = tpu.concatenate %206, %207 in 1 : vector<4x1xf32>, vector<4x255xf32> -> vector<4x256xf32>
    %c2_i32_53 = arith.constant 2 : i32
    %c0_i32_54 = arith.constant 0 : i32
    %209 = arith.cmpi eq, %c2_i32_53, %c0_i32_54 : i32
    %c1_i32_55 = arith.constant 1 : i32
    %210 = arith.select %209, %c1_i32_55, %c2_i32_53 : i32
    %211 = vector.broadcast %210 : i32 to vector<4x256xi32>
    %212 = arith.remsi %202, %211 : vector<4x256xi32>
    %c0_i32_56 = arith.constant 0 : i32
    %213 = vector.broadcast %c0_i32_56 : i32 to vector<4x256xi32>
    %214 = arith.cmpi ne, %212, %213 : vector<4x256xi32>
    %c0_i32_57 = arith.constant 0 : i32
    %215 = vector.broadcast %c0_i32_57 : i32 to vector<4x256xi32>
    %216 = arith.cmpi slt, %212, %215 : vector<4x256xi32>
    %c0_i32_58 = arith.constant 0 : i32
    %217 = arith.cmpi slt, %210, %c0_i32_58 : i32
    %218 = vector.broadcast %217 : i1 to vector<4x256xi1>
    %219 = vector.broadcast %218 : vector<4x256xi1> to vector<4x256xi1>
    %220 = arith.xori %216, %219 : vector<4x256xi1>
    %221 = arith.andi %220, %214 : vector<4x256xi1>
    %222 = vector.broadcast %210 : i32 to vector<4x256xi32>
    %223 = arith.addi %212, %222 : vector<4x256xi32>
    %224 = arith.select %221, %223, %212 : vector<4x256xi1>, vector<4x256xi32>
    %c1_i32_59 = arith.constant 1 : i32
    %225 = vector.broadcast %c1_i32_59 : i32 to vector<4x256xi32>
    %226 = arith.cmpi slt, %224, %225 : vector<4x256xi32>
    %227 = arith.select %226, %205, %208 : vector<4x256xi1>, vector<4x256xf32>
    %228 = arith.addf %201, %227 : vector<4x256xf32>
    %229 = vector.extract_strided_slice %228 {offsets = [0, 2], sizes = [4, 254], strides = [1, 1]} : vector<4x256xf32> to vector<4x254xf32>
    %230 = vector.extract_strided_slice %228 {offsets = [0, 0], sizes = [4, 2], strides = [1, 1]} : vector<4x256xf32> to vector<4x2xf32>
    %231 = tpu.concatenate %229, %230 in 1 : vector<4x254xf32>, vector<4x2xf32> -> vector<4x256xf32>
    %232 = vector.extract_strided_slice %228 {offsets = [0, 254], sizes = [4, 2], strides = [1, 1]} : vector<4x256xf32> to vector<4x2xf32>
    %233 = vector.extract_strided_slice %228 {offsets = [0, 0], sizes = [4, 254], strides = [1, 1]} : vector<4x256xf32> to vector<4x254xf32>
    %234 = tpu.concatenate %232, %233 in 1 : vector<4x2xf32>, vector<4x254xf32> -> vector<4x256xf32>
    %c4_i32_60 = arith.constant 4 : i32
    %c0_i32_61 = arith.constant 0 : i32
    %235 = arith.cmpi eq, %c4_i32_60, %c0_i32_61 : i32
    %c1_i32_62 = arith.constant 1 : i32
    %236 = arith.select %235, %c1_i32_62, %c4_i32_60 : i32
    %237 = vector.broadcast %236 : i32 to vector<4x256xi32>
    %238 = arith.remsi %202, %237 : vector<4x256xi32>
    %c0_i32_63 = arith.constant 0 : i32
    %239 = vector.broadcast %c0_i32_63 : i32 to vector<4x256xi32>
    %240 = arith.cmpi ne, %238, %239 : vector<4x256xi32>
    %c0_i32_64 = arith.constant 0 : i32
    %241 = vector.broadcast %c0_i32_64 : i32 to vector<4x256xi32>
    %242 = arith.cmpi slt, %238, %241 : vector<4x256xi32>
    %c0_i32_65 = arith.constant 0 : i32
    %243 = arith.cmpi slt, %236, %c0_i32_65 : i32
    %244 = vector.broadcast %243 : i1 to vector<4x256xi1>
    %245 = vector.broadcast %244 : vector<4x256xi1> to vector<4x256xi1>
    %246 = arith.xori %242, %245 : vector<4x256xi1>
    %247 = arith.andi %246, %240 : vector<4x256xi1>
    %248 = vector.broadcast %236 : i32 to vector<4x256xi32>
    %249 = arith.addi %238, %248 : vector<4x256xi32>
    %250 = arith.select %247, %249, %238 : vector<4x256xi1>, vector<4x256xi32>
    %c2_i32_66 = arith.constant 2 : i32
    %251 = vector.broadcast %c2_i32_66 : i32 to vector<4x256xi32>
    %252 = arith.cmpi slt, %250, %251 : vector<4x256xi32>
    %253 = arith.select %252, %231, %234 : vector<4x256xi1>, vector<4x256xf32>
    %254 = arith.addf %228, %253 : vector<4x256xf32>
    %255 = math.log %254 : vector<4x256xf32>
    %256 = arith.subf %200, %255 : vector<4x256xf32>
    %257 = math.exp %146 : vector<4x256xf32>
    %258 = arith.subf %146, %256 : vector<4x256xf32>
    %259 = arith.mulf %257, %258 : vector<4x256xf32>
    %c0_67 = arith.constant 0 : index
    %c0_68 = arith.constant 0 : index
    %c0_69 = arith.constant 0 : index
    %260 = vector.load %arg5[%c0_67, %c0_68, %c0_69] : memref<1x4x256xf32, #tpu.memory_space<vmem>>, vector<1x4x256xf32>
    %261 = vector.shape_cast %260 : vector<1x4x256xf32> to vector<4x256xf32>
    %cst_70 = arith.constant 5.000000e-01 : f32
    %262 = vector.broadcast %cst_70 : f32 to vector<4x256xf32>
    %263 = arith.mulf %262, %259 : vector<4x256xf32>
    %264 = arith.addf %36, %263 : vector<4x256xf32>
    %265 = arith.addf %261, %264 : vector<4x256xf32>
    %c0_71 = arith.constant 0 : index
    %c0_72 = arith.constant 0 : index
    %c0_73 = arith.constant 0 : index
    %266 = vector.load %arg5[%c0_71, %c0_72, %c0_73] : memref<1x4x256xf32, #tpu.memory_space<vmem>>, vector<1x4x256xf32>
    %267 = vector.shape_cast %266 : vector<1x4x256xf32> to vector<4x256xf32>
    %268 = vector.shape_cast %265 : vector<4x256xf32> to vector<1x4x256xf32>
    tpu.vector_store %arg5[%c0_71, %c0_72, %c0_73], %268 {strides = array<i32>} : memref<1x4x256xf32, #tpu.memory_space<vmem>>, vector<1x4x256xf32>,
    return
  }
  func.func @transform_0(%arg0: i32, %arg1: i32) -> (i32, i32, i32) {
    %c0_i32 = arith.constant 0 : i32
    %c0_i32_0 = arith.constant 0 : i32
    return %arg0, %c0_i32, %arg1 : i32, i32, i32
  }
  func.func @transform_1(%arg0: i32, %arg1: i32) -> (i32, i32, i32) {
    %c0_i32 = arith.constant 0 : i32
    %c0_i32_0 = arith.constant 0 : i32
    return %arg0, %c0_i32, %arg1 : i32, i32, i32
  }
  func.func @transform_2(%arg0: i32, %arg1: i32) -> (i32, i32, i32) {
    %c0_i32 = arith.constant 0 : i32
    %c0_i32_0 = arith.constant 0 : i32
    return %arg0, %c0_i32, %arg1 : i32, i32, i32
  }
  func.func @transform_3(%arg0: i32, %arg1: i32) -> (i32, i32, i32) {
    %c0_i32 = arith.constant 0 : i32
    %c0_i32_0 = arith.constant 0 : i32
    %c0_i32_1 = arith.constant 0 : i32
    return %arg0, %c0_i32, %c0_i32_0 : i32, i32, i32
  }
}

</mosaic_0001>

<bundles_post_ra>
// kernel: tpu_custom_call.1
= control target key start
LH: loop header
LB: loop body
LE: loop exit
PB: predicated region body
PF: predicated region fallthrough
CT: control target
= control target key end

     0   :  { %8 = vsyncpa [#allocation3], 0  ;;  %s1559_s0 = inlined_call_operand.hbm [shape: f32[2,4,256], index: 0, kind: input, shape index: {}]   ;;  %s1560_s1 = inlined_call_operand.hbm [shape: f32[2,4,256], index: 1, kind: input, shape index: {}]   ;;  %s1561_s2 = inlined_call_operand.vmem [shape: s32[2,1,256], index: 2, kind: input, shape index: {}]   ;;  %s1562_s3 = inlined_call_operand.hbm [shape: f32[2,4,256], index: 3, kind: output, shape index: {}]  }
   0x1   :  { %10 = vsyncpa [#allocation3 + $0x1], 0 }
   0x2   :  { %11 = vsyncpa [#allocation6], 0 }
   0x3   :  { %13 = vsyncpa [#allocation6 + $0x1], 0 }
   0x4   :  { %14 = vsyncpa [#allocation4], 0 }
   0x5   :  { %16 = vsyncpa [#allocation4 + $0x1], 0  ;;  %s1140_s12 = smov 0   ;;  %s1142_s13 = smov 0  }
   0x6   :  { %s1144_s14 = smov 0   ;;  %s1146_s15 = smov 0  }
   0x7   :  { %s1148_s16 = smov 0   ;;  %s1150_s17 = smov 0  }
   0x8 LB: > { %s846_s18 = sadd.s32 4294967295, %s1111_s17   ;;  %s847_s19 = sadd.s32 4294967294, %s1111_s17   ;;  %s1111_s17 = sphi %s1150_s17, %s22_s17   ;;  %s1107_s16 = sphi %s1148_s16, %s1590_s16   ;;  %s1103_s15 = sphi %s1146_s15, %s1589_s15   ;;  %s1099_s14 = sphi %s1144_s14, %s1588_s14   ;;  %s1095_s13 = sphi %s1142_s13, %s1587_s13   ;;  %s1091_s12 = sphi %s1140_s12, %s1586_s12  }
   0x9   : > { %s34_s20 = sadd.s32 1, %s1107_s16  ;;  %s43_s21 = sadd.s32 1, %s1099_s14 }
   0xa   : > { %p36_p0 = scmp.ge.s32.totalorder %s34_s20, 2  ;;  %p50_p1 = scmp.ne.s32.totalorder %s1099_s14, %s1095_s13 }
   0xb   : > { %p51_p2 = scmp.eq.s32.totalorder %s1111_s17, 0  ;;  %p56_p3 = scmp.ne.s32.totalorder %s1095_s13, %s1091_s12 }
   0xc   : > { %s1592_s20 = smov (%p36_p0, %s34_s20), 0  ;;  %p57_p5 = scmp.eq.s32.totalorder %s846_s18, 0 }
   0xd   : > { %p1181_p4 = por %p51_p2, %p50_p1  ;;  %s38_s23 = ssub.s32 %s1107_s16, %s1592_s20 }
   0xe   : > { %p136_p6 = scmp.eq.s32.totalorder %s846_s18, 1  ;;  %p41_p7 = scmp.eq.s32.totalorder %s38_s23, 0 }
   0xf   : > { %p1187_p8 = por %p57_p5, %p56_p3  ;;  %p142_p10 = scmp.eq.s32.totalorder %s847_s19, 1 }
  0x10   : > { %p1191_p9 = por %p136_p6, %p50_p1  ;;  %p886_p13 = scmp.lt.s32.totalorder %s1111_s17, 2 }
  0x11   : > { %s1566_s24 = scalar_select %p1187_p8, 1, 0 }
  0x12   : > { %s1567_s25 = scalar_select %p1191_p9, 1, 0 }
  0x13   : > { %s1196_s26 = scalar_select %p41_p7, %s1099_s14, %s43_s21  }
  0x14   : > { %p1198_p11 = por %p142_p10, %p56_p3  ;;  %s1205_s28 = sand.u32 1, %s1099_s14  }
  0x15   : > { %s850_s29 = sshll.u32 %s1205_s28, 3  ;;  %s866_s30 = sshll.u32 %s1107_s16, 7 }
  0x16   : > { %s1568_s27 = scalar_select %p1198_p11, 1, 0 }
  0x17   : > { %s1214_s6 = scalar_lea.hbm %s1559_s0, %s866_s30  ;;  %s166_s7 = scalar_lea.vmem [#allocation2], %s850_s29 }
  0x18   : > { %s176_s8 = sshll.u32 %s166_s7, 4  ;;  %p1222_p0 = pnand %p886_p13, %p1181_p4  ;;  %s1218_s8 = int_to_ptr.vmem [resolvable:$true] %s176_s8 }
  0x19   : > { %s163_s10 = scalar_lea.sflag [#allocation3], %s1205_s28  ;;  %s965_s11 = scalar_lea.hbm %s1214_s6, 128 }
  0x1a   : > { %p966_p3 = scmp.ne.s32.totalorder %s1214_s6, %s965_s11  ;;  %p967_p5 = pneg %p1222_p0 }
  0x1b   : > { %s970_s21 = scalar_lea.hbm %s1559_s0, 256  ;;  %p971_p4 = scmp.lt.u32.totalorder %s1214_s6, %s1559_s0 }
  0x1c   : > { %p968_p6 = pnand %p967_p5, %p966_p3  ;;  %p972_p10 = scmp.lt.u32.totalorder %s970_s21, %s965_s11 }
  0x1d   : > { %p974_p12 = scmp.lt.u32.totalorder %s965_s11, %s1214_s6 }
  0x1e   : > { %p969_p7 = pneg %p968_p6  ;;  %p973_p13 = por %p972_p10, %p971_p4 }
  0x20   : > { %p975_p1 = por %p974_p12, %p973_p13 }
  0x22   : > { %p976_p2 = pnand %p975_p1, %p969_p7 }
  0x24   : > { %979 = shalt.err (!%p976_p2)
}
  0x25   : > { %s980_s4 = scalar_lea.vmem %s1218_s8, 128  ;;  %s1113_s5 = smov [#allocation2]  }
  0x26   : > { %p981_p3 = scmp.ne.s32.totalorder %s1218_s8, %s980_s4  ;;  %s985_s7 = sshll.u32 %s1113_s5, 4  ;;  %s986_s7 = int_to_ptr.vmem [resolvable:$false] %s985_s7 }
  0x27   : > { %s987_s18 = scalar_lea.vmem %s986_s7, 256  ;;  %p988_p9 = scmp.lt.s32.totalorder %s1218_s8, %s986_s7 }
  0x28   : > { %p983_p6 = pnand %p981_p3, %p967_p5  ;;  %p989_p4 = scmp.lt.s32.totalorder %s987_s18, %s980_s4 }
  0x2a   : > { %p984_p11 = pneg %p983_p6  ;;  %p990_p10 = por %p989_p4, %p988_p9 }
  0x2c   : > { %p991_p12 = pnand %p990_p10, %p984_p11 }
  0x2e   : > { %994 = shalt.err (!%p991_p12)
}
  0x2f   : > { %878 = dma.hbm_to_vmem [thread:$0]  (!%p1222_p0), %s1214_s6, 128, %s1218_s8, %s163_s10  }
  0x30   : > { %p1570_p1 = scmp.lt.s32.totalorder %s1111_s17, 3  ;;  %p1571_p2 = scmp.ge.s32.totalorder %s1111_s17, 1 }
  0x31   : > { %s1267_s22 = scalar_lea.hbm %s1560_s1, %s866_s30  ;;  %s187_s23 = scalar_lea.vmem [#allocation5], %s850_s29 }
  0x32   : > { %p1258_p7 = pnand %p1571_p2, %p1570_p1  ;;  %s197_s4 = sshll.u32 %s187_s23, 4  ;;  %s198_s4 = int_to_ptr.vmem [resolvable:$true] %s197_s4 }
  0x33   : > { %s184_s6 = scalar_lea.sflag [#allocation6], %s1205_s28  ;;  %s995_s8 = scalar_lea.hbm %s1267_s22, 128 }
  0x34   : > { %s1572_s11 = scalar_select %p1258_p7, 1, 0 }
  0x35   : > { %p996_p9 = scmp.ne.s32.totalorder %s1267_s22, %s995_s8  ;;  %s1000_s30 = scalar_lea.hbm %s1560_s1, 256 }
  0x36   : > { %p1001_p3 = scmp.lt.u32.totalorder %s1267_s22, %s1560_s1  ;;  %p1002_p6 = scmp.lt.u32.totalorder %s1000_s30, %s995_s8 }
  0x37   : > { %p998_p11 = pnand %p996_p9, %p967_p5  ;;  %p1004_p10 = scmp.lt.u32.totalorder %s995_s8, %s1267_s22 }
  0x38   : > { %p1003_p4 = por %p1002_p6, %p1001_p3 }
  0x39   : > { %p999_p13 = pneg %p998_p11 }
  0x3a   : > { %p1005_p12 = por %p1004_p10, %p1003_p4 }
  0x3c   : > { %p1006_p1 = pnand %p1005_p12, %p999_p13 }
  0x3e   : > { %1009 = shalt.err (!%p1006_p1)
}
  0x3f   : > { %s1010_s28 = scalar_lea.vmem %s198_s4, 128  ;;  %s1114_s29 = smov [#allocation5]  }
  0x40   : > { %p1011_p2 = scmp.ne.s32.totalorder %s198_s4, %s1010_s28  ;;  %s1015_s19 = sshll.u32 %s1114_s29, 4  ;;  %s1016_s19 = int_to_ptr.vmem [resolvable:$false] %s1015_s19 }
  0x41   : > { %s1017_s21 = scalar_lea.vmem %s1016_s19, 256  ;;  %p1018_p8 = scmp.lt.s32.totalorder %s198_s4, %s1016_s19 }
  0x42   : > { %p1013_p9 = pnand %p1011_p2, %p967_p5  ;;  %p1019_p7 = scmp.lt.s32.totalorder %s1017_s21, %s1010_s28 }
  0x44   : > { %p1014_p11 = pneg %p1013_p9  ;;  %p1020_p3 = por %p1019_p7, %p1018_p8 }
  0x46   : > { %p1021_p6 = pnand %p1020_p3, %p1014_p11 }
  0x48   : > { %1024 = shalt.err (!%p1021_p6)
}
  0x49   : > { %881 = dma.hbm_to_vmem [thread:$0]  (!%p1222_p0), %s1267_s22, 128, %s198_s4, %s184_s6  }
  0x4a   : > { %p1573_p13 = scmp.ne.s32.totalorder %s1572_s11, 0 }
  0x4b   : > { %s1294_s23 = sand.u32 (!%p1573_p13), 1, %s1095_s13   ;;  %p1574_p8 = scmp.ne.s32.totalorder (!%p1573_p13), %s1566_s24, 0 }
  0x4c   : > { %218 = sbr.rel (%p1573_p13) target bundleno = 662 (0x296), region = 32  ;;  %s1297_s8 = sshll.u32 (!%p1573_p13), %s1294_s23, 3 }
  0x4d   : > { %s221_s10 = scalar_lea.sflag (!%p1573_p13), [#allocation3], %s1294_s23  ;;  %s224_s5 = scalar_lea.vmem (!%p1573_p13), [#allocation2], %s1297_s8 }
  0x53   : > { %1078 = dma.done.wait (%p1574_p8), %s221_s10, 128  }
  0x54   : > { %1080 = vsyncadd (%p1574_p8), %s221_s10, 4294967168  ;;  %s230_s9 = scalar_lea.sflag [#allocation6], %s1294_s23  ;;  %s233_s11 = scalar_lea.vmem [#allocation5], %s1297_s8 }
  0x55   : > { %1082 = dma.done.wait (%p1574_p8), %s230_s9, 128  }
  0x56   : > { %1084 = vsyncadd (%p1574_p8), %s230_s9, 4294967168  ;;  %v1311_v0 = vld [vmem:[%s224_s5] sm:$0xff]  ;;  %s1115_s22 = smov 127   ;;  %s1116_s4 = smov 1   ;;  %v1321_v2 = vld [vmem:[%s233_s11] sm:$0xff]  ;;  %v389_v4 = vlaneseq  ;;  %vm416_vm0 = vcmask 1039360  }
  0x57   : > { %412 = vrot.lane.b32.xlu0 %v1311_v0, %s1115_s22  ;;  %v1317_v1 = vcombine.high %v1311_v0, %v1311_v0  ;;  %v1329_v3 = vcombine.high %v1321_v2, %v1321_v2  ;;  %vm427_vm1 = vcmask 7168   ;;  %s1117_s24 = smov 126   ;;  %s1118_s6 = smov 2   ;;  %vm471_vm4 = vcmask 1031168  }
  0x58   : > { %v410_v5 = vand.u32 127, %v389_v4  ;;  %vm482_vm5 = vcmask 15360   ;;  %vm291_vm8 = vcmask 1043456   ;;  %p272_p0 = scmp.lt.s32.totalorder %s1103_s15, 1  ;;  %s868_s19 = sshll.u32 %s1103_s15, 7 }
  0x59   : > { %422 = vrot.lane.b32.xlu1 %v1317_v1, %s1116_s4  ;;  %s268_s21 = scalar_lea.vmem [#allocation7], %s1297_s8  ;;  %s1510_s11 = scalar_lea.hbm %s1562_s3, %s868_s19 }
  0x5a   : > { %v411_v6 = vadd.s32 128, %v410_v5  ;;  %v436_v8 = vand.u32 1, %v410_v5  ;;  %v491_v38 = vand.u32 3, %v410_v5  ;;  %s273_s30 = scalar_select %p272_p0, %s1103_s15, 1 }
  0x5b   : > { %414 = vrot.lane.b32.xlu0 %v1317_v1, %s1115_s22  ;;  %s724_s10 = sshll.u32 %s268_s21, 4  ;;  %p1583_p7 = scmp.ne.s32.totalorder %s1567_s25, 0  ;;  %s1512_s10 = int_to_ptr.vmem [resolvable:$true] %s724_s10 }
  0x5c   : > { %v443_v9 = vand.u32 1, %v411_v6  ;;  %vm1340_vm2 = vcmp.lt.s32.totalorder %v436_v8, 1  ;;  %v498_v39 = vand.u32 3, %v411_v6  ;;  %vm1374_vm6 = vcmp.lt.s32.totalorder %v491_v38, 2  ;;  %s860_s7 = sshll.u32 %s273_s30, 1  ;;  %s1119_s15 = smov [#allocation7]  }
  0x5d   : > { %425 = vrot.lane.b32.xlu1 %v1311_v0, %s1116_s4  ;;  %s278_s29 = scalar_lea.vmem %s1561_s2, %s860_s7  ;;  %s1029_s8 = sshll.u32 %s1119_s15, 4  ;;  %s1030_s8 = int_to_ptr.vmem [resolvable:$false] %s1029_s8 }
  0x5e   : > { %vm1344_vm3 = vcmp.lt.s32.totalorder %v443_v9, 1  ;;  %vm1378_vm7 = vcmp.lt.s32.totalorder %v498_v39, 2  ;;  %p1032_p12 = scmp.lt.s32.totalorder %s1512_s10, %s1030_s8 }
  0x5f   : > { %580 = vrot.lane.b32.xlu0 %v1321_v2, %s1115_s22 }
  0x61   : > { %582 = vrot.lane.b32.xlu1 %v1329_v3, %s1115_s22 }
  0x63   : > { %589 = vrot.lane.b32.xlu0 %v1329_v3, %s1116_s4 }
  0x65   : > { %592 = vrot.lane.b32.xlu1 %v1321_v2, %s1116_s4 }
  0xc9   : > { %v413_v7 = vpop.permute.xlu0 %412 }
  0xcb   : > { %v423_v10 = vpop.permute.xlu1 %422 }
  0xcd   : > { %v415_v11 = vpop.permute.xlu0 %414 }
  0xce   : > { %v417_v15 = vsel %vm416_vm0, %v413_v7, %v415_v11  ;;  %v421_v16 = vsel %vm416_vm0, %v415_v11, %v413_v7 }
  0xcf   : > { %v426_v14 = vpop.permute.xlu1 %425 }
  0xd0   : > { %v428_v17 = vsel %vm427_vm1, %v426_v14, %v423_v10  ;;  %v431_v18 = vsel %vm427_vm1, %v423_v10, %v426_v14 }
  0xd1   : > { %v458_v19 = vsel %vm1340_vm2, %v417_v15, %v431_v18  ;;  %v459_v20 = vsel %vm1344_vm3, %v421_v16, %v428_v17  ;;  %v581_v21 = vpop.permute.xlu0 %580  ;;  %v292_v16 = vsel %vm291_vm8, %v1311_v0, -inf  ;;  %v299_v17 = vsel %vm291_vm8, %v1317_v1, -inf }
  0xd2   : > { %v462_v22 = vcombine.low %v458_v19, %v459_v20  ;;  %v342_v18 = vsel %vm291_vm8, %v1321_v2, -inf  ;;  %v349_v19 = vsel %vm291_vm8, %v1329_v3, -inf  ;;  %v293_v20 = vrot.slane %v292_v16, 4 }
  0xd3   : > { %v583_v23 = vpop.permute.xlu1 %582 }
  0xd4   : > { %v464_v24 = vmax.f32 %v1311_v0, %v462_v22  ;;  %v584_v26 = vsel %vm416_vm0, %v581_v21, %v583_v23  ;;  %v588_v27 = vsel %vm416_vm0, %v583_v23, %v581_v21  ;;  %v300_v21 = vrot.slane %v299_v17, 4 }
  0xd5   : > { %v590_v25 = vpop.permute.xlu0 %589  ;;  %v343_v22 = vrot.slane %v342_v18, 4  ;;  %v350_v23 = vrot.slane %v349_v19, 4 }
  0xd6   : > { %467 = vrot.lane.b32.xlu0 %v464_v24, %s1117_s24  ;;  %v466_v28 = vcombine.high %v464_v24, %v464_v24 }
  0xd7   : > { %v593_v29 = vpop.permute.xlu1 %592 }
  0xd8   : > { %v594_v30 = vsel %vm427_vm1, %v593_v29, %v590_v25  ;;  %v597_v31 = vsel %vm427_vm1, %v590_v25, %v593_v29  ;;  %469 = vrot.lane.b32.xlu1 %v466_v28, %s1117_s24  ;;  %v301_v25 = vmax.f32 %v299_v17, %v300_v21 }
  0xd9   : > { %v598_v32 = vsel %vm1340_vm2, %v584_v26, %v597_v31  ;;  %v599_v33 = vsel %vm1344_vm3, %v588_v27, %v594_v30  ;;  %v344_v26 = vmax.f32 %v342_v18, %v343_v22  ;;  %v351_v27 = vmax.f32 %v349_v19, %v350_v23 }
  0xda   : > { %v602_v34 = vcombine.low %v598_v32, %v599_v33  ;;  %477 = vrot.lane.b32.xlu0 %v466_v28, %s1118_s6  ;;  %v302_v29 = vrot.slane %v301_v25, 2 }
  0xdb   : > { %v345_v30 = vrot.slane %v344_v26, 2  ;;  %v352_v31 = vrot.slane %v351_v27, 2 }
  0xdc   : > { %v604_v35 = vmax.f32 %v1321_v2, %v602_v34  ;;  %480 = vrot.lane.b32.xlu1 %v464_v24, %s1118_s6  ;;  %v303_v1 = vmax.f32 %v301_v25, %v302_v29 }
  0xdd   : > { %v346_v33 = vmax.f32 %v344_v26, %v345_v30  ;;  %v353_v34 = vmax.f32 %v351_v27, %v352_v31 }
  0xde   : > { %607 = vrot.lane.b32.xlu0 %v604_v35, %s1117_s24  ;;  %v606_v36 = vcombine.high %v604_v35, %v604_v35 }
  0xdf   : > { %v354_v3 = vrot.slane %v353_v34, 1 }
  0xe0   : > { %609 = vrot.lane.b32.xlu1 %v606_v36, %s1117_s24 }
  0xe2   : > { %616 = vrot.lane.b32.xlu0 %v606_v36, %s1118_s6  ;;  %v304_v36 = vrot.slane %v303_v1, 1 }
  0xe4   : > { %619 = vrot.lane.b32.xlu1 %v604_v35, %s1118_s6  ;;  %v305_v39 = vmax.f32 %v303_v1, %v304_v36 }
 0x148   : > { %v468_v37 = vpop.permute.xlu0 %467 }
 0x14a   : > { %v470_v40 = vpop.permute.xlu1 %469 }
 0x14b   : > { %v472_v45 = vsel %vm471_vm4, %v468_v37, %v470_v40  ;;  %v476_v46 = vsel %vm471_vm4, %v470_v40, %v468_v37  ;;  %v347_v37 = vrot.slane %v346_v33, 1 }
 0x14c   : > { %v478_v41 = vpop.permute.xlu0 %477 }
 0x14d   : > { %v348_v40 = vmax.f32 %v346_v33, %v347_v37 }
 0x14e   : > { %v481_v44 = vpop.permute.xlu1 %480 }
 0x14f   : > { %v483_v47 = vsel %vm482_vm5, %v481_v44, %v478_v41  ;;  %v486_v48 = vsel %vm482_vm5, %v478_v41, %v481_v44  ;;  %v355_v41 = vmax.f32 %v353_v34, %v354_v3 }
 0x150   : > { %v513_v49 = vsel %vm1374_vm6, %v472_v45, %v486_v48  ;;  %v514_v50 = vsel %vm1378_vm7, %v476_v46, %v483_v47  ;;  %v608_v51 = vpop.permute.xlu0 %607 }
 0x151   : > { %v517_v52 = vcombine.low %v513_v49, %v514_v50  ;;  %v358_v45 = vcombine.low %v348_v40, %v355_v41 }
 0x152   : > { %v610_v53 = vpop.permute.xlu1 %609 }
 0x153   : > { %v519_v54 = vmax.f32 %v464_v24, %v517_v52  ;;  %v611_v56 = vsel %vm471_vm4, %v608_v51, %v610_v53  ;;  %v615_v60 = vsel %vm471_vm4, %v610_v53, %v608_v51  ;;  %v294_v24 = vmax.f32 %v292_v16, %v293_v20 }
 0x154   : > { %v617_v57 = vpop.permute.xlu0 %616  ;;  %v1438_v47 = vsub.f32 %v1321_v2, %v358_v45 }
 0x155   : > { %v1391_v55 = vsub.f32 %v1311_v0, %v519_v54  ;;  %v295_v28 = vrot.slane %v294_v24, 2 }
 0x156   : > { %v620_v58 = vpop.permute.xlu1 %619  ;;  %v361_v49 = vmul.f32 1.442695, %v1438_v47 }
 0x157   : > { %v521_v59 = vmul.f32 1.442695, %v1391_v55  ;;  %v621_v61 = vsel %vm482_vm5, %v620_v58, %v617_v57  ;;  %v624_v62 = vsel %vm482_vm5, %v617_v57, %v620_v58  ;;  %v296_v32 = vmax.f32 %v294_v24, %v295_v28 }
 0x158   : > { %v625_v63 = vsel %vm1374_vm6, %v611_v56, %v624_v62  ;;  %v626_v5 = vsel %vm1378_vm7, %v615_v60, %v621_v61 }
 0x159   : > { %943 = vpow2.f32 %v521_v59  ;;  %v629_v6 = vcombine.low %v625_v63, %v626_v5 }
 0x15b   : > { %v631_v7 = vmax.f32 %v604_v35, %v629_v6  ;;  %v297_v35 = vrot.slane %v296_v32, 1 }
 0x15d   : > { %v1403_v8 = vsub.f32 %v1321_v2, %v631_v7  ;;  %v298_v38 = vmax.f32 %v296_v32, %v297_v35 }
 0x15f   : > { %v633_v9 = vmul.f32 1.442695, %v1403_v8  ;;  %v308_v44 = vcombine.low %v298_v38, %v305_v39 }
 0x161   : > { %945 = vpow2.f32 %v633_v9  ;;  %v1435_v46 = vsub.f32 %v1311_v0, %v308_v44 }
 0x163   : > { %v1406_v10 = vpop.eup %943  ;;  %v311_v48 = vmul.f32 1.442695, %v1435_v46 }
 0x164   : > { %525 = vrot.lane.b32.xlu0 %v1406_v10, %s1115_s22  ;;  %v524_v11 = vcombine.high %v1406_v10, %v1406_v10 }
 0x165   : > { %947 = vpow2.f32 %v311_v48 }
 0x166   : > { %527 = vrot.lane.b32.xlu1 %v524_v11, %s1115_s22  ;;  %949 = vpow2.f32 %v361_v49 }
 0x168   : > { %534 = vrot.lane.b32.xlu0 %v524_v11, %s1116_s4 }
 0x16a   : > { %537 = vrot.lane.b32.xlu1 %v1406_v10, %s1116_s4 }
 0x16b   : > { %v1416_v14 = vpop.eup %945 }
 0x16c   : > { %637 = vrot.lane.b32.xlu0 %v1416_v14, %s1115_s22  ;;  %v636_v15 = vcombine.high %v1416_v14, %v1416_v14 }
 0x16e   : > { %639 = vrot.lane.b32.xlu1 %v636_v15, %s1115_s22  ;;  %s710_s22 = scalar_lea.sflag [#allocation4], %s1294_s23 }
 0x16f   : > { %v948_v50 = vpop.eup %947 }
 0x170   : > { %646 = vrot.lane.b32.xlu0 %v636_v15, %s1116_s4  ;;  %v950_v51 = vpop.eup %949  ;;  %v314_v52 = vcombine.high %v948_v50, %v948_v50  ;;  %v316_v53 = vsel %vm291_vm8, %v948_v50, 0.0 }
 0x171   : > { %v364_v54 = vcombine.high %v950_v51, %v950_v51  ;;  %v366_v56 = vsel %vm291_vm8, %v950_v51, 0.0  ;;  %v317_v57 = vrot.slane %v316_v53, 4 }
 0x172   : > { %649 = vrot.lane.b32.xlu1 %v1416_v14, %s1116_s4  ;;  %v323_v0 = vsel %vm291_vm8, %v314_v52, 0.0  ;;  %v367_v58 = vrot.slane %v366_v56, 4  ;;  %s1025_s4 = scalar_lea.vmem %s1512_s10, 128 }
 0x173   : > { %v373_v2 = vsel %vm291_vm8, %v364_v54, 0.0  ;;  %v324_v59 = vrot.slane %v323_v0, 4  ;;  %v318_v60 = vadd.f32 %v317_v57, %v316_v53  ;;  %p1026_p5 = scmp.ne.s32.totalorder %s1512_s10, %s1025_s4 }
 0x174   : > { %v374_v61 = vrot.slane %v373_v2, 4  ;;  %v368_v62 = vadd.f32 %v367_v58, %v366_v56 }
 0x175   : > { %v325_v63 = vadd.f32 %v324_v59, %v323_v0  ;;  %v319_v5 = vrot.slane %v318_v60, 2  ;;  %p1027_p4 = pnand %p1026_p5, %p1583_p7 }
 0x176   : > { %v375_v6 = vadd.f32 %v374_v61, %v373_v2  ;;  %v369_v7 = vrot.slane %v368_v62, 2 }
 0x177   : > { %v326_v9 = vrot.slane %v325_v63, 2  ;;  %v320_v11 = vadd.f32 %v319_v5, %v318_v60  ;;  %v390_v60 = vshrl.u32 %v389_v4, 7  ;;  %v287_v5 = vld [vmem:[%s278_s29] sm:$0x3]  ;;  %p1028_p10 = pneg %p1027_p4 }
 0x178   : > { %v376_v15 = vrot.slane %v375_v6, 2  ;;  %v370_v16 = vadd.f32 %v369_v7, %v368_v62 }
 0x179   : > { %v327_v18 = vadd.f32 %v326_v9, %v325_v63  ;;  %v321_v19 = vrot.slane %v320_v11, 1  ;;  %v393_v63 = vsub.s32 0, %v390_v60  ;;  %v397_v7 = vsub.s32 1, %v390_v60 }
 0x17a   : > { %v377_v20 = vadd.f32 %v376_v15, %v375_v6  ;;  %v371_v22 = vrot.slane %v370_v16, 1 }
 0x17b   : > { %v328_v24 = vrot.slane %v327_v18, 1  ;;  %v322_v25 = vadd.f32 %v321_v19, %v320_v11  ;;  %v394_v6 = vrot.slane %v287_v5, %v393_v63  ;;  %v398_v11 = vrot.slane %v287_v5, %v397_v7 }
 0x17c   : > { %v378_v26 = vrot.slane %v377_v20, 1  ;;  %v372_v32 = vadd.f32 %v371_v22, %v370_v16 }
 0x17d   : > { %v329_v35 = vadd.f32 %v328_v24, %v327_v18  ;;  %951 = vlog2.f32 %v322_v25  ;;  %vm399_vm9 = vcmp.eq.s32.totalorder %v390_v60, %v394_v6  ;;  %vm400_vm10 = vcmp.eq.s32.totalorder %v390_v60, %v398_v11 }
 0x17e   : > { %v379_v37 = vadd.f32 %v378_v26, %v377_v20  ;;  %953 = vlog2.f32 %v372_v32 }
 0x17f   : > { %955 = vlog2.f32 %v329_v35 }
 0x180   : > { %957 = vlog2.f32 %v379_v37 }
 0x187   : > { %v952_v53 = vpop.eup %951 }
 0x188   : > { %v954_v56 = vpop.eup %953  ;;  %v331_v57 = vmul.f32 0.6931472, %v952_v53 }
 0x189   : > { %v956_v12 = vpop.eup %955  ;;  %v381_v2 = vmul.f32 0.6931472, %v954_v56 }
 0x18a   : > { %v958_v13 = vpop.eup %957  ;;  %v333_v0 = vmul.f32 0.6931472, %v956_v12 }
 0x18c   : > { %v336_v58 = vcombine.low %v331_v57, %v333_v0 }
 0x18e   : > { %v338_v61 = vsub.f32 %v1435_v46, %v336_v58 }
 0x1d6   : > { %v526_v17 = vpop.permute.xlu0 %525 }
 0x1d8   : > { %v528_v21 = vpop.permute.xlu1 %527 }
 0x1d9   : > { %v529_v28 = vsel %vm416_vm0, %v526_v17, %v528_v21  ;;  %v533_v29 = vsel %vm416_vm0, %v528_v21, %v526_v17 }
 0x1da   : > { %v535_v23 = vpop.permute.xlu0 %534 }
 0x1dc   : > { %v538_v27 = vpop.permute.xlu1 %537 }
 0x1dd   : > { %v539_v30 = vsel %vm427_vm1, %v538_v27, %v535_v23  ;;  %v542_v31 = vsel %vm427_vm1, %v535_v23, %v538_v27 }
 0x1de   : > { %v543_v1 = vsel %vm1340_vm2, %v529_v28, %v542_v31  ;;  %v544_v33 = vsel %vm1344_vm3, %v533_v29, %v539_v30  ;;  %v638_v34 = vpop.permute.xlu0 %637 }
 0x1df   : > { %v547_v36 = vcombine.low %v543_v1, %v544_v33 }
 0x1e0   : > { %v640_v3 = vpop.permute.xlu1 %639 }
 0x1e1   : > { %v1455_v38 = vadd.f32 %v1406_v10, %v547_v36  ;;  %v641_v44 = vsel %vm416_vm0, %v638_v34, %v640_v3  ;;  %v645_v45 = vsel %vm416_vm0, %v640_v3, %v638_v34 }
 0x1e2   : > { %v647_v40 = vpop.permute.xlu0 %646 }
 0x1e3   : > { %552 = vrot.lane.b32.xlu0 %v1455_v38, %s1117_s24  ;;  %v551_v39 = vcombine.high %v1455_v38, %v1455_v38 }
 0x1e4   : > { %v650_v41 = vpop.permute.xlu1 %649 }
 0x1e5   : > { %v651_v48 = vsel %vm427_vm1, %v650_v41, %v647_v40  ;;  %v654_v10 = vsel %vm427_vm1, %v647_v40, %v650_v41  ;;  %554 = vrot.lane.b32.xlu1 %v551_v39, %s1117_s24 }
 0x1e6   : > { %v655_v49 = vsel %vm1340_vm2, %v641_v44, %v654_v10  ;;  %v656_v50 = vsel %vm1344_vm3, %v645_v45, %v651_v48 }
 0x1e7   : > { %v659_v51 = vcombine.low %v655_v49, %v656_v50  ;;  %561 = vrot.lane.b32.xlu0 %v551_v39, %s1118_s6 }
 0x1e9   : > { %v661_v52 = vadd.f32 %v1416_v14, %v659_v51  ;;  %564 = vrot.lane.b32.xlu1 %v1455_v38, %s1118_s6  ;;  %v383_v14 = vmul.f32 0.6931472, %v958_v13 }
 0x1eb   : > { %664 = vrot.lane.b32.xlu0 %v661_v52, %s1117_s24  ;;  %v663_v54 = vcombine.high %v661_v52, %v661_v52  ;;  %v386_v59 = vcombine.low %v381_v2, %v383_v14 }
 0x1ed   : > { %666 = vrot.lane.b32.xlu1 %v663_v54, %s1117_s24  ;;  %v388_v62 = vsub.f32 %v1438_v47, %v386_v59  ;;  %s1031_s24 = scalar_lea.vmem %s1030_s8, 256 }
 0x1ee   : > { %p1033_p1 = scmp.lt.s32.totalorder %s1031_s24, %s1025_s4 }
 0x1ef   : > { %673 = vrot.lane.b32.xlu0 %v663_v54, %s1118_s6  ;;  %v401_v9 = vadd.f32 %v388_v62, %v338_v61 }
 0x1f0   : > { %p1034_p2 = por %p1033_p1, %p1032_p12 }
 0x1f1   : > { %676 = vrot.lane.b32.xlu1 %v661_v52, %s1118_s6  ;;  %v403_v15 = vcombine.high %v401_v9, %v401_v9  ;;  %v405_v16 = vsel %vm399_vm9, %v401_v9, 0.0 }
 0x1f2   : > { %v407_v49 = vsub.f32 0.0, %v405_v16  ;;  %p1035_p9 = pnand %p1034_p2, %p1028_p10 }
 0x1f3   : > { %v406_v4 = vsel %vm400_vm10, %v403_v15, 0.0 }
 0x1f4   : > { %v408_v50 = vsub.f32 0.0, %v406_v4 }
 0x255   : > { %v553_v17 = vpop.permute.xlu0 %552 }
 0x257   : > { %v555_v46 = vpop.permute.xlu1 %554 }
 0x258   : > { %v556_v19 = vsel %vm471_vm4, %v553_v17, %v555_v46  ;;  %v560_v20 = vsel %vm471_vm4, %v555_v46, %v553_v17 }
 0x259   : > { %v562_v18 = vpop.permute.xlu0 %561 }
 0x25b   : > { %v565_v47 = vpop.permute.xlu1 %564 }
 0x25c   : > { %v566_v21 = vsel %vm482_vm5, %v565_v47, %v562_v18  ;;  %v569_v22 = vsel %vm482_vm5, %v562_v18, %v565_v47 }
 0x25d   : > { %v570_v23 = vsel %vm1374_vm6, %v556_v19, %v569_v22  ;;  %v571_v24 = vsel %vm1378_vm7, %v560_v20, %v566_v21  ;;  %v665_v25 = vpop.permute.xlu0 %664 }
 0x25e   : > { %v574_v26 = vcombine.low %v570_v23, %v571_v24 }
 0x25f   : > { %v667_v27 = vpop.permute.xlu1 %666 }
 0x260   : > { %v576_v28 = vadd.f32 %v574_v26, %v1455_v38  ;;  %v668_v31 = vsel %vm471_vm4, %v665_v25, %v667_v27  ;;  %v672_v32 = vsel %vm471_vm4, %v667_v27, %v665_v25 }
 0x261   : > { %v674_v29 = vpop.permute.xlu0 %673 }
 0x262   : > { %959 = vlog2.f32 %v576_v28 }
 0x263   : > { %v677_v30 = vpop.permute.xlu1 %676 }
 0x264   : > { %v678_v1 = vsel %vm482_vm5, %v677_v30, %v674_v29  ;;  %v681_v33 = vsel %vm482_vm5, %v674_v29, %v677_v30 }
 0x265   : > { %v682_v34 = vsel %vm1374_vm6, %v668_v31, %v681_v33  ;;  %v683_v35 = vsel %vm1378_vm7, %v672_v32, %v678_v1 }
 0x266   : > { %v686_v36 = vcombine.low %v682_v34, %v683_v35 }
 0x268   : > { %v688_v37 = vadd.f32 %v686_v36, %v661_v52 }
 0x26a   : > { %961 = vlog2.f32 %v688_v37 }
 0x26c   : > { %v960_v3 = vpop.eup %959 }
 0x26d   : > { %v578_v38 = vmul.f32 0.6931472, %v960_v3 }
 0x26f   : > { %v579_v39 = vsub.f32 %v1391_v55, %v578_v38 }
 0x271   : > { %v692_v40 = vmul.f32 1.442695, %v579_v39 }
 0x273   : > { %963 = vpow2.f32 %v692_v40 }
 0x274   : > { %v962_v41 = vpop.eup %961 }
 0x275   : > { %v690_v44 = vmul.f32 0.6931472, %v962_v41 }
 0x277   : > { %v691_v45 = vsub.f32 %v1403_v8, %v690_v44 }
 0x279   : > { %v694_v42 = vsub.f32 %v579_v39, %v691_v45 }
 0x27d   : > { %v964_v48 = vpop.eup %963 }
 0x27e   : > { %v695_v43 = vmul.f32 %v964_v48, %v694_v42 }
 0x280   : > { %v697_v10 = vmul.f32 0.5, %v695_v43 }
 0x282   : > { %v699_v51 = vcombine.high %v697_v10, %v697_v10  ;;  %v701_v52 = vadd.f32 %v697_v10, %v407_v49 }
 0x284   : > { %v702_v53 = vadd.f32 %v699_v51, %v408_v50 }
 0x286   : > { %v705_v55 = vcombine.low %v701_v52, %v702_v53 }
 0x288   : > { %708 = vst [vmem:[%s268_s21] sm:$0xff] %v705_v55 }
 0x289   : > { %1038 = shalt.err (!%p1035_p9)
}
 0x28a   : > { %s1039_s23 = scalar_lea.hbm %s1510_s11, 128  ;;  %s1043_s7 = scalar_lea.hbm %s1562_s3, 256 }
 0x28b   : > { %p1040_p11 = scmp.ne.s32.totalorder %s1510_s11, %s1039_s23  ;;  %p1044_p13 = scmp.lt.u32.totalorder %s1510_s11, %s1562_s3 }
 0x28c   : > { %p1045_p8 = scmp.lt.u32.totalorder %s1043_s7, %s1039_s23  ;;  %p1047_p5 = scmp.lt.u32.totalorder %s1039_s23, %s1510_s11 }
 0x28d   : > { %p1041_p3 = pnand %p1040_p11, %p1583_p7 }
 0x28e   : > { %p1046_p0 = por %p1045_p8, %p1044_p13 }
 0x28f   : > { %p1042_p6 = pneg %p1041_p3 }
 0x290   : > { %p1048_p4 = por %p1047_p5, %p1046_p0 }
 0x292   : > { %p1049_p10 = pnand %p1048_p4, %p1042_p6 }
 0x294   : > { %1052 = shalt.err (!%p1049_p10)
}
 0x295   : > { %873 = dma.vmem_to_hbm [thread:$0]  (%p1583_p7), %s1512_s10, 128, %s1510_s11, %s710_s22  }
 0x296 PF: > { %s736_s29 = sand.u32 1, %s1091_s12   ;;  %p1584_p12 = scmp.ne.s32.totalorder %s1568_s27, 0 }
 0x297   : > { %p1585_p1 = scmp.ge.s32.totalorder %s1111_s17, 2  ;;  %s737_s19 = scalar_lea.sflag [#allocation4], %s736_s29 }
 0x299   : > { %p883_p2 = pnand %p1585_p1, %p1584_p12 }
 0x29b   : > { %1086 = dma.done.wait (!%p883_p2), %s737_s19, 128  }
 0x29c   : > { %1088 = vsyncadd (!%p883_p2), %s737_s19, 4294967168  ;;  %s22_s17 = sadd.s32 1, %s1111_s17   ;;  %s1586_s12 = smov %s1095_s13 }
 0x29d   : > { %p19_p9 = scmp.ge.s32.totalorder %s22_s17, 4   ;;  %s1587_s13 = smov %s1099_s14 }
 0x29e   : > { %s1588_s14 = smov %s1196_s26  ;;  %s1589_s15 = smov %s1107_s16 }
 0x29f   : > { %s1590_s16 = smov %s1592_s20  ;;  %21 = sbr.rel (!%p19_p9) target bundleno = 8 (0x8), region = 97 }
 0x2a6   :  { %742 = vsyncpa [#allocation3], 1 }
 0x2a7   :  { %744 = vsyncpa [#allocation3 + $0x1], 1 }
 0x2a8   :  { %745 = vsyncpa [#allocation6], 1 }
 0x2a9   :  { %747 = vsyncpa [#allocation6 + $0x1], 1 }
 0x2aa   :  { %748 = vsyncpa [#allocation4], 1 }
 0x2ab   :  { %750 = vsyncpa [#allocation4 + $0x1], 1 }

</bundles_post_ra>
